<compile_context>
chip_gen: v6e
topology: v6e:2x2x1
jax: 0.10.0
libtpu: 0.0.40
codegen_flags: <defaults>
</compile_context>

<pallas_src>
import jax
import jax.numpy as jnp
from jax import lax
from jax.experimental import pallas as pl
from jax.experimental.pallas import tpu as pltpu


def _round_up(x, m):
    return (x + m - 1) // m * m


def _pick_tk(e_pad, tk_request):
    """Largest multiple of 128 that divides e_pad and is <= tk_request."""
    best = 128
    d = 256
    while d <= min(tk_request, e_pad):
        if e_pad % d == 0:
            best = d
        d += 128
    return min(best, e_pad)


def _mlm_small_kernel(x_ref, w_ref, b_ref, o_ref):
    # Whole (E, C) weight resident in VMEM; single MXU dot + bias epilogue.
    o_ref[...] = (
        jnp.dot(x_ref[...], w_ref[...], preferred_element_type=jnp.float32)
        + b_ref[...]
    ).astype(o_ref.dtype)


def _mlm_tiled_kernel(x_ref, w_ref, b_ref, o_ref):
    # x_ref: (tm, tk) bf16, w_ref: (tk, tn) bf16 (weight pre-transposed to (E, C)),
    # b_ref: (1, tn) f32, o_ref: (tm, tn) f32 output doubling as the accumulator.
    k = pl.program_id(2)

    @pl.when(k == 0)
    def _():
        o_ref[...] = jnp.zeros_like(o_ref)

    o_ref[...] += jnp.dot(x_ref[...], w_ref[...], preferred_element_type=jnp.float32)

    @pl.when(k == pl.num_programs(2) - 1)
    def _():
        o_ref[...] += b_ref[...]


def mlm_classifier_forward(x, weight, bias, *, tm=512, tn=1024, tk=512,
                           compute_dtype=jnp.bfloat16,
                           small_weight_bytes=2 << 20):
    """Pallas forward pass of MLMClassifier.

    x:      (B, S, E) float32
    weight: (C, E)    float32  -- PyTorch nn.Linear layout
    bias:   (C,)      float32
    returns logits (B, S, C), same dtype as x (f32 accumulation throughout).
    """
    B, S, E = x.shape
    C = weight.shape[0]
    M = B * S

    dsize = jnp.dtype(compute_dtype).itemsize
    # bf16 packs 2 rows per sublane -> keep the M tile a multiple of 16.
    m_align = 16 if dsize < 4 else 8

    # TODO(synk): in a real model, pre-transpose/cast the constant weight once at
    # init time instead of per forward call (it is a constant parameter).
    x2d = x.reshape(M, E).astype(compute_dtype)
    w_t = weight.T.astype(compute_dtype)           # (E, C): plain A @ B on the MXU
    b2d = bias.reshape(1, C).astype(jnp.float32)

    out_dtype = jnp.float32

    # ---------------- small-head fast path: weight fully resident ----------------
    if C * E * dsize <= small_weight_bytes and C <= 1024 and E <= 1024:
        tm_s = min(tm, _round_up(M, m_align))
        grid = (pl.cdiv(M, tm_s),)
        cost = pl.CostEstimate(
            flops=2 * M * E * C,
            transcendentals=0,
            bytes_accessed=int(M * E * dsize + E * C * dsize + M * C * 4 + C * 4),
        )
        out2d = pl.pallas_call(
            _mlm_small_kernel,
            out_shape=jax.ShapeDtypeStruct((M, C), out_dtype),
            grid_spec=pltpu.PrefetchScalarGridSpec(
                num_scalar_prefetch=0,
                grid=grid,
                in_specs=[
                    pl.BlockSpec((tm_s, E), lambda i: (i, 0)),   # x tile
                    pl.BlockSpec((E, C), lambda i: (0, 0)),      # resident weight
                    pl.BlockSpec((1, C), lambda i: (0, 0)),      # bias
                ],
                out_specs=pl.BlockSpec((tm_s, C), lambda i: (i, 0)),
            ),
            compiler_params=pltpu.CompilerParams(
                dimension_semantics=("parallel",),
            ),
            cost_estimate=cost,
        )(x2d, w_t, b2d)
        return out2d.reshape(B, S, C).astype(x.dtype)

    # ---------------- general tiled path: (i, j, k), reduction last ----------------
    tm = min(tm, _round_up(M, m_align))
    tn = min(tn, _round_up(C, 128))
    E_pad = _round_up(E, 128)
    tk = _pick_tk(E_pad, tk)

    # Only the contraction dim must be padded (garbage there would corrupt real
    # outputs); partial M / C edge blocks are fine: OOB reads only feed output
    # positions that are masked on write.
    if E_pad != E:
        x2d = jnp.pad(x2d, ((0, 0), (0, E_pad - E)))
        w_t = jnp.pad(w_t, ((0, E_pad - E), (0, 0)))

    gi, gj, gk = pl.cdiv(M, tm), pl.cdiv(C, tn), E_pad // tk
    grid = (gi, gj, gk)

    cost = pl.CostEstimate(
        flops=2 * M * E_pad * C,
        transcendentals=0,
        bytes_accessed=int(gi * C * E_pad * dsize      # weight re-streamed per i block
                           + gj * M * E_pad * dsize    # x re-streamed per j block
                           + M * C * 4                 # output written once
                           + gi * C * 4),              # bias
    )

    # TODO(synk): if the trace shows exposed weight DMA, add
    # pipeline_mode=pl.Buffered(3) on the weight BlockSpec.
    out2d = pl.pallas_call(
        _mlm_tiled_kernel,
        out_shape=jax.ShapeDtypeStruct((M, C), out_dtype),
        grid_spec=pltpu.PrefetchScalarGridSpec(
            num_scalar_prefetch=0,
            grid=grid,
            in_specs=[
                pl.BlockSpec((tm, tk), lambda i, j, k: (i, k)),   # x tile
                pl.BlockSpec((tk, tn), lambda i, j, k: (k, j)),   # weight (E, C) tile
                pl.BlockSpec((1, tn), lambda i, j, k: (0, j)),    # bias tile
            ],
            out_specs=pl.BlockSpec((tm, tn), lambda i, j, k: (i, j)),
        ),
        compiler_params=pltpu.CompilerParams(
            dimension_semantics=("parallel", "parallel", "arbitrary"),
        ),
        cost_estimate=cost,
    )(x2d, w_t, b2d)

    return out2d.reshape(B, S, C).astype(x.dtype)


if __name__ == "__main__":
    key = jax.random.PRNGKey(0)
    keys = jax.random.split(key, 6)

    def run_case(batch, seq, emb_dim, num_classes, case_keys):
        kx, kw, kb = case_keys
        x = jax.random.normal(kx, (batch, seq, emb_dim), dtype=jnp.float32)
        # nn.Linear shapes: weight (C, E), bias (C,).
        weight = jax.random.normal(kw, (num_classes, emb_dim), dtype=jnp.float32) * 0.02
        bias = jax.random.normal(kb, (num_classes,), dtype=jnp.float32) * 0.02

        logits = mlm_classifier_forward(x, weight, bias)
        jax.block_until_ready(logits)
        assert logits.shape == (batch, seq, num_classes)

        # Reference with the same bf16 input rounding (kernel accumulates in f32),
        # so the comparison isolates the kernel from bf16's intrinsic cast error.
        xr = x.astype(jnp.bfloat16).astype(jnp.float32)
        wr = weight.astype(jnp.bfloat16).astype(jnp.float32)
        ref = jnp.einsum("bse,ce->bsc", xr, wr,
                         precision=lax.Precision.HIGHEST) + bias
        err = float(jnp.max(jnp.abs(logits - ref)))
        assert jnp.allclose(logits, ref, atol=1e-3, rtol=1e-3), err

    # Small shapes consistent with (batch_size, seq_length, embedding_dim):
    # exercises the resident-weight fast path.
    run_case(2, 8, 32, 16, keys[:3])
    # Larger head: exercises the tiled (i, j, k) path with the E reduction last.
    run_case(2, 64, 384, 3072, keys[3:])

    print("KERNEL_OK")
</pallas_src>

<mosaic_0001>
module attributes {stable_mosaic.version = 11 : i64} {
  func.func @_mlm_small_kernel(%arg0: i32, %arg1: memref<16x32xbf16, #tpu.memory_space<vmem>>, %arg2: memref<32x16xbf16, #tpu.memory_space<vmem>>, %arg3: memref<1x16xf32, #tpu.memory_space<vmem>>, %arg4: memref<16x16xf32, #tpu.memory_space<vmem>>) attributes {dimension_semantics = [#tpu.dimension_semantics<parallel>], iteration_bounds = array<i64: 1>, scalar_prefetch = 0 : i64, scratch_operands = 0 : i64, tpu.core_type = #tpu.core_type<tc>, window_params = [{transform_indices = @transform_0, window_bounds = array<i64: 16, 32>}, {pipeline_mode = #tpu.pipeline_mode<synchronous>, transform_indices = @transform_1, window_bounds = array<i64: 32, 16>}, {pipeline_mode = #tpu.pipeline_mode<synchronous>, transform_indices = @transform_2, window_bounds = array<i64: 1, 16>}, {transform_indices = @transform_3, window_bounds = array<i64: 16, 16>}]} {
    %c0 = arith.constant 0 : index
    %c0_0 = arith.constant 0 : index
    %0 = vector.load %arg1[%c0, %c0_0] : memref<16x32xbf16, #tpu.memory_space<vmem>>, vector<16x32xbf16>
    %c0_1 = arith.constant 0 : index
    %c0_2 = arith.constant 0 : index
    %1 = vector.load %arg2[%c0_1, %c0_2] : memref<32x16xbf16, #tpu.memory_space<vmem>>, vector<32x16xbf16>
    %cst = arith.constant dense<0.000000e+00> : vector<16x16xf32>
    %2 = tpu.matmul %0, %1, %cst {dimension_numbers = #tpu.dot_dimension_numbers<[1], [0], [0], [1], [0, 0, 1, 1], [], []>} : vector<16x32xbf16>, vector<32x16xbf16>, vector<16x16xf32> -> vector<16x16xf32>
    %c0_3 = arith.constant 0 : index
    %c0_4 = arith.constant 0 : index
    %3 = vector.load %arg3[%c0_3, %c0_4] : memref<1x16xf32, #tpu.memory_space<vmem>>, vector<1x16xf32>
    %4 = vector.broadcast %3 : vector<1x16xf32> to vector<16x16xf32>
    %5 = arith.addf %2, %4 : vector<16x16xf32>
    %c0_5 = arith.constant 0 : index
    %c0_6 = arith.constant 0 : index
    %6 = vector.load %arg4[%c0_5, %c0_6] : memref<16x16xf32, #tpu.memory_space<vmem>>, vector<16x16xf32>
    tpu.vector_store %arg4[%c0_5, %c0_6], %5 {strides = array<i32>} : memref<16x16xf32, #tpu.memory_space<vmem>>, vector<16x16xf32>,
    return
  }
  func.func @transform_0(%arg0: i32) -> (i32, i32) {
    %c0_i32 = arith.constant 0 : i32
    %c0_i32_0 = arith.constant 0 : i32
    return %arg0, %c0_i32 : i32, i32
  }
  func.func @transform_1(%arg0: i32) -> (i32, i32) {
    %c0_i32 = arith.constant 0 : i32
    %c0_i32_0 = arith.constant 0 : i32
    %c0_i32_1 = arith.constant 0 : i32
    return %c0_i32, %c0_i32_0 : i32, i32
  }
  func.func @transform_2(%arg0: i32) -> (i32, i32) {
    %c0_i32 = arith.constant 0 : i32
    %c0_i32_0 = arith.constant 0 : i32
    %c0_i32_1 = arith.constant 0 : i32
    return %c0_i32, %c0_i32_0 : i32, i32
  }
  func.func @transform_3(%arg0: i32) -> (i32, i32) {
    %c0_i32 = arith.constant 0 : i32
    %c0_i32_0 = arith.constant 0 : i32
    return %arg0, %c0_i32 : i32, i32
  }
}

</mosaic_0001>

<bundles_post_ra>
// kernel: tpu_custom_call.1
= control target key start
LH: loop header
LB: loop body
LE: loop exit
PB: predicated region body
PF: predicated region fallthrough
CT: control target
= control target key end

     0   :  { %v156_v1 = vmov 0.0   ;;  %vm157_vm0 = vmmov 0   ;;  %s196_s0 = inlined_call_operand.vmem [shape: bf16[16,32], index: 0, kind: input, shape index: {}]   ;;  %s197_s1 = inlined_call_operand.vmem [shape: bf16[32,16], index: 1, kind: input, shape index: {}]   ;;  %s198_s2 = inlined_call_operand.vmem [shape: f32[1,16], index: 2, kind: input, shape index: {}]   ;;  %s199_s3 = inlined_call_operand.hbm [shape: f32[16,16], index: 3, kind: output, shape index: {}]  }
   0x1   :  { %v131_v0 = vld [vmem:[%s197_s1 + $0x8] sm:$0xff]   ;;  %118 = vmatprep.subr.bf16.mxu0 %v156_v1  ;;  %v132_v2 = vld [vmem:[%s197_s1] sm:$0xff]   ;;  %122 = vmatprep.mubr.msk.bf16.mxu0 %vm157_vm0, %v156_v1 }
   0x2   :  { %119 = vmatpush3.bf16.msra.mxu0 %v131_v0 }
   0x3   :  { %120 = vmatprep.subr.bf16.mxu0 %v156_v1 }
   0x4   :  { %8 = vsyncpa [#allocation3], 0  ;;  %v133_v3 = vld [vmem:[%s196_s0] sm:$0xff]   ;;  %vm46_vm1 = vcmask 261120   ;;  %vm91_vm2 = vcmask 130048   ;;  %s158_s20 = smov [#allocation2]  }
   0x5   :  { %v110_v4 = vld [vmem:[%s198_s2] ss:$0 sm:$0xff]  ;;  %s99_s1 = sshll.u32 %s158_s20, 4  ;;  %s100_s1 = int_to_ptr.vmem [resolvable:$true] %s99_s1 }
   0x6   :  { %121 = vmatpush3.bf16.msra.mxu0 %v132_v2  ;;  %s134_s0 = scalar_lea.vmem %s100_s1, 256  ;;  %p139_p1 = scmp.lt.s32.totalorder %s100_s1, %s100_s1 }
   0x7   :  { %p135_p0 = scmp.ne.s32.totalorder %s100_s1, %s134_s0  ;;  %p140_p2 = scmp.lt.s32.totalorder %s134_s0, %s134_s0 }
   0x9   :  { %123 = vmatmul.mubr.msk.bf16.vlgmr.msra.gmra.mxu0 %vm46_vm1, %v133_v3  ;;  %p141_p3 = por %p140_p2, %p139_p1 }
   0xb   :  { %p142_p4 = pnand %p141_p3, %p135_p0 }
  0xc9   :  { %v84_v5 = vpop.f32.mrf.mxu0 }
  0xca   :  { %v85_v6 = vadd.f32 %v110_v4, %v84_v5 }
  0xcb   :  { %v124_v7 = vpop.f32.mrf.mxu0 }
  0xcc   :  { %92 = vst.msk [vmem:[#allocation2] sm:$0xff] %vm91_vm2, %v85_v6 }
  0xcd   :  { %v87_v8 = vpop.f32.mrf.mxu0 }
  0xce   :  { %v88_v9 = vadd.f32 %v110_v4, %v87_v8 }
  0xcf   :  { %v125_v10 = vpop.f32.mrf.mxu0 }
  0xd0   :  { %93 = vst.msk [vmem:[#allocation2 + $0x8] sm:$0xff] %vm91_vm2, %v88_v9 }
  0xd1   :  { %145 = shalt.err (!%p142_p4)
}
  0xd2   :  { %s159_s2 = smov 128   ;;  %s160_s21 = smov 8  }
  0xd3   :  { %105 = dma.vmem_to_hbm [thread:$0]  %s100_s1, 256, %s199_s3, [#allocation3], %s159_s2, %s159_s2, %s160_s21  }
  0xd4   :  { %154 = dma.done.wait [#allocation3], 256  }
  0xd5   :  { %155 = vsyncadd [#allocation3], 4294967040 }
  0xd6   :  { %109 = vsyncpa [#allocation3], 1 }

</bundles_post_ra>
